<compile_context>
chip_gen: v5e
topology: v5e:2x2
jax: 0.10.0
libtpu: 0.0.40
codegen_flags: <defaults>
</compile_context>

<pallas_src>
import jax
import jax.numpy as jnp
from jax.experimental import pallas as pl
from jax.experimental.pallas import tpu as pltpu


# --------------------------------------------------------------------------
# Kernel: per-pair MLP logits + self-loop mask.
# --------------------------------------------------------------------------
def _edge_logits_kernel(nodes_ref, w1_ref, b1_ref, w2_ref, b2_ref, logit_ref):
    nodes = nodes_ref[...]                                    # (Bt, D, N) f32
    bt, d, n = nodes.shape

    # edge_decoder: Linear(2D->D) + ReLU + Linear(D->1), evaluated as
    # h_k[b,i,j] = b1[k] + sum_c nodes[b,c,i]*w1[c,k] + nodes[b,c,j]*w1[D+c,k]
    # built from O(N) row/col vectors and rank-1 broadcasts -> (Bt, N, N).
    logit = jnp.zeros((bt, n, n), jnp.float32) + b2_ref[0, 0]
    for k in range(d):
        row = jnp.zeros((bt, n), jnp.float32)                 # source-node part
        col = jnp.zeros((bt, n), jnp.float32)                 # target-node part
        for c in range(d):
            row = row + nodes[:, c, :] * w1_ref[c, k]
            col = col + nodes[:, c, :] * w1_ref[d + c, k]
        h = b1_ref[0, k] + row[:, :, None] + col[:, None, :]  # (Bt, N, N)
        h = jnp.maximum(h, 0.0)                               # ReLU
        logit = logit + h * w2_ref[k, 0]

    # Self-loop / identical-embedding mask: sum_c |n_i - n_j| == 0 -> -10.
    diff = jnp.zeros((bt, n, n), jnp.float32)
    for c in range(d):
        diff = diff + jnp.abs(nodes[:, c, :, None] - nodes[:, c, None, :])
    logit_ref[...] = jnp.where(diff != 0.0, logit, jnp.float32(-10.0))


# --------------------------------------------------------------------------
# Generation-aware block sizing.
# --------------------------------------------------------------------------
def _chip_params():
    """Returns (num_tensorcores_sharing_the_grid, target block bytes)."""
    kind = ""
    try:
        kind = jax.devices()[0].device_kind.lower()
    except Exception:  # pragma: no cover - defensive; fall back to safe defaults
        pass
    if "v7" in kind or "v4" in kind:
        return 2, 12 << 20      # 2 TCs; bigger blocks amortize per-step overhead
    if "v6" in kind:
        return 1, 8 << 20       # 1 TC; 32 MiB scoped-VMEM default
    return 1, 4 << 20           # v5e / unknown; 16 MiB scoped-VMEM default


def _block_footprint_bytes(bt, N, D):
    """Single-buffer VMEM bytes for one grid step (logit out + nodes in), f32."""
    lane = pl.cdiv(N, 128) * 128
    subl = pl.cdiv(N, 8) * 8
    out_b = bt * subl * lane * 4
    in_b = bt * max(8, D) * lane * 4
    return out_b + in_b


def _pick_block_b(B, N, D, num_cores, target_bytes):
    """Graphs per grid step: a divisor of B, sized to ~target_bytes, with
    >=2 (and preferably even) grid steps only on multi-TensorCore chips."""
    per_graph = max(1, _block_footprint_bytes(1, N, D))
    bt = max(1, target_bytes // per_graph)
    bt = int(min(bt, B))
    if num_cores >= 2 and B >= 2:
        bt = min(bt, B // 2)                 # keep >= 2 grid steps for megacore
    bt = max(1, bt)
    while B % bt != 0:
        bt -= 1
    if num_cores >= 2:                       # prefer an even number of steps
        while bt > 1 and (B // bt) % 2 != 0:
            bt -= 1
            while B % bt != 0:
                bt -= 1
    return bt


# --------------------------------------------------------------------------
# Wrapper: forward pass of EdgeExistanceModule.
# --------------------------------------------------------------------------
def edge_existance_forward(emb_nodes, edge_lists, params, block_b=None):
    """Pallas implementation of EdgeExistanceModule.forward.

    emb_nodes:  (B, N, D) float
    edge_lists: list of B int arrays, each (2, E_b) (per-graph edge indices)
    params:     (w1 (2D, D), b1 (D,), w2 (D, 1), b2 (1,))  [x @ W convention]
    returns:    (batch_embeddings (B, N*N, 2D),
                 batch_logits     (B, N*N),
                 batch_truth      (B, N*N))
    """
    w1, b1, w2, b2 = params
    B, N, D = emb_nodes.shape
    nodes_f32 = emb_nodes.astype(jnp.float32)

    num_cores, target_bytes = _chip_params()
    bt = _pick_block_b(B, N, D, num_cores, target_bytes) if block_b is None else block_b
    assert B % bt == 0

    # vmem_limit sized for the double-buffered footprint (+1 MiB slack),
    # clamped to stay well under v7x's 64 MiB physical VMEM.
    vmem_limit = int(min(max(2 * _block_footprint_bytes(bt, N, D) + (1 << 20),
                             16 << 20), 48 << 20))

    # Channel-major node features: each channel is a lane-dense length-N row.
    nodes_t = jnp.transpose(nodes_f32, (0, 2, 1))             # (B, D, N)

    smem = pl.BlockSpec(memory_space=pltpu.MemorySpace.SMEM)
    cost = pl.CostEstimate(
        flops=int(B * N * N * (6 * D + 8)),
        transcendentals=0,
        bytes_accessed=int(B * D * N * 4 + B * N * N * 4),
    )

    logits_nn = pl.pallas_call(
        _edge_logits_kernel,
        grid=(B // bt,),
        in_specs=[
            pl.BlockSpec((bt, D, N), lambda b: (b, 0, 0)),
            smem, smem, smem, smem,
        ],
        out_specs=pl.BlockSpec((bt, N, N), lambda b: (b, 0, 0)),
        out_shape=jax.ShapeDtypeStruct((B, N, N), jnp.float32),
        compiler_params=pltpu.CompilerParams(
            dimension_semantics=("parallel",),
            vmem_limit_bytes=vmem_limit,
        ),
        cost_estimate=cost,
    )(
        nodes_t,
        w1.astype(jnp.float32),
        b1.reshape(1, D).astype(jnp.float32),
        w2.astype(jnp.float32),
        b2.reshape(1, 1).astype(jnp.float32),
    )
    batch_logits = logits_nn.reshape(B, N * N)       # free row-major bitcast

    # Pair embeddings: pure broadcast data movement -> single XLA fusion.
    # Row p = i*N+j holds [nodes[i], nodes[j]] (repeat_interleave / repeat).
    inter = jnp.broadcast_to(nodes_f32[:, :, None, :], (B, N, N, D))
    rep = jnp.broadcast_to(nodes_f32[:, None, :, :], (B, N, N, D))
    batch_embeddings = jnp.concatenate([inter, rep], axis=-1).reshape(B, N * N, 2 * D)

    # Ground-truth adjacency: one batched scatter over all graphs.
    b_idx = jnp.concatenate([
        jnp.full((int(e.shape[1]),), bi, dtype=jnp.int32)
        for bi, e in enumerate(edge_lists)])
    src = jnp.concatenate([e[0].astype(jnp.int32) for e in edge_lists])
    dst = jnp.concatenate([e[1].astype(jnp.int32) for e in edge_lists])
    truth = jnp.zeros((B, N, N), jnp.float32).at[b_idx, src, dst].set(1.0)
    batch_truth = truth.reshape(B, N * N)

    return batch_embeddings, batch_logits, batch_truth


# --------------------------------------------------------------------------
# Pure-JAX replica of the PyTorch forward (for correctness checking).
# --------------------------------------------------------------------------
def _reference(emb_nodes, edge_lists, params):
    w1, b1, w2, b2 = params
    B, N, D = emb_nodes.shape
    embs, logits, truths = [], [], []
    for bi in range(B):
        nodes = emb_nodes[bi]
        inter = jnp.repeat(nodes, N, axis=0)          # repeat_interleave
        rep = jnp.tile(nodes, (N, 1))                 # .repeat(N, 1)
        pair = jnp.concatenate([inter, rep], axis=1)  # (N*N, 2D)
        h = jnp.maximum(pair @ w1 + b1, 0.0)
        lg = (h @ w2 + b2)[:, 0]
        mask = jnp.sum(jnp.abs(inter - rep), axis=1) != 0.0
        lg = jnp.where(mask, lg, -10.0)
        t = jnp.zeros((N, N), jnp.float32)
        t = t.at[edge_lists[bi][0], edge_lists[bi][1]].set(1.0).reshape(-1)
        embs.append(pair)
        logits.append(lg)
        truths.append(t)
    return jnp.stack(embs), jnp.stack(logits), jnp.stack(truths)


if __name__ == "__main__":
    B, N, D = 2, 8, 2  # dim=2 as in the module's __init__ default

    key = jax.random.PRNGKey(0)
    k_nodes, k_w1, k_b1, k_w2, k_b2 = jax.random.split(key, 5)

    emb_nodes = jax.random.normal(k_nodes, (B, N, D), dtype=jnp.float32)

    # Deterministic parameter init (PyTorch Linear default: U(-1/sqrt(fan_in), ...)).
    bound1 = 1.0 / (2 * D) ** 0.5
    bound2 = 1.0 / D ** 0.5
    w1 = jax.random.uniform(k_w1, (2 * D, D), jnp.float32, -bound1, bound1)
    b1 = jax.random.uniform(k_b1, (D,), jnp.float32, -bound1, bound1)
    w2 = jax.random.uniform(k_w2, (D, 1), jnp.float32, -bound2, bound2)
    b2 = jax.random.uniform(k_b2, (1,), jnp.float32, -bound2, bound2)
    params = (w1, b1, w2, b2)

    # Per-graph edge lists (shape (2, E) each), as produced by unbatch_edge_index.
    edge_lists = [
        jnp.array([[0, 1, 2, 3, 4], [1, 2, 3, 4, 5]], dtype=jnp.int32),
        jnp.array([[0, 2, 4, 6], [7, 5, 3, 1]], dtype=jnp.int32),
    ]

    out_emb, out_logits, out_truth = edge_existance_forward(
        emb_nodes, edge_lists, params)
    jax.block_until_ready((out_emb, out_logits, out_truth))

    ref_emb, ref_logits, ref_truth = _reference(emb_nodes, edge_lists, params)

    assert out_emb.shape == (B, N * N, 2 * D)
    assert out_logits.shape == (B, N * N)
    assert out_truth.shape == (B, N * N)
    assert jnp.allclose(out_emb, ref_emb, atol=1e-5)
    assert jnp.allclose(out_logits, ref_logits, atol=1e-5)
    assert jnp.allclose(out_truth, ref_truth, atol=1e-5)

    print("KERNEL_OK")
</pallas_src>

<mosaic_0001>
module attributes {stable_mosaic.version = 11 : i64} {
  func.func @_edge_logits_kernel(%arg0: i32, %arg1: memref<2x2x8xf32, #tpu.memory_space<vmem>>, %arg2: memref<4x2xf32, #tpu.memory_space<smem>>, %arg3: memref<1x2xf32, #tpu.memory_space<smem>>, %arg4: memref<2x1xf32, #tpu.memory_space<smem>>, %arg5: memref<1x1xf32, #tpu.memory_space<smem>>, %arg6: memref<2x8x8xf32, #tpu.memory_space<vmem>>) attributes {dimension_semantics = [#tpu.dimension_semantics<parallel>], iteration_bounds = array<i64: 1>, scalar_prefetch = 0 : i64, scratch_operands = 0 : i64, tpu.core_type = #tpu.core_type<tc>, window_params = [{transform_indices = @transform_0, window_bounds = array<i64: 2, 2, 8>}, {transform_indices = @transform_1, window_bounds = array<i64: 4, 2>}, {transform_indices = @transform_2, window_bounds = array<i64: 1, 2>}, {transform_indices = @transform_3, window_bounds = array<i64: 2, 1>}, {transform_indices = @transform_4, window_bounds = array<i64: 1, 1>}, {transform_indices = @transform_5, window_bounds = array<i64: 2, 8, 8>}]} {
    %c0 = arith.constant 0 : index
    %c0_0 = arith.constant 0 : index
    %c0_1 = arith.constant 0 : index
    %0 = vector.load %arg1[%c0, %c0_0, %c0_1] : memref<2x2x8xf32, #tpu.memory_space<vmem>>, vector<2x2x8xf32>
    %cst = arith.constant 0.000000e+00 : f32
    %1 = vector.broadcast %cst : f32 to vector<2x8x8xf32>
    %c0_2 = arith.constant 0 : index
    %c0_3 = arith.constant 0 : index
    %2 = memref.load %arg5[%c0_2, %c0_3] : memref<1x1xf32, #tpu.memory_space<smem>>
    %3 = vector.broadcast %2 : f32 to vector<2x8x8xf32>
    %4 = arith.addf %1, %3 : vector<2x8x8xf32>
    %cst_4 = arith.constant 0.000000e+00 : f32
    %5 = vector.broadcast %cst_4 : f32 to vector<2x8xf32>
    %cst_5 = arith.constant 0.000000e+00 : f32
    %6 = vector.broadcast %cst_5 : f32 to vector<2x8xf32>
    %7 = vector.extract_strided_slice %0 {offsets = [0, 0, 0], sizes = [2, 1, 8], strides = [1, 1, 1]} : vector<2x2x8xf32> to vector<2x1x8xf32>
    %8 = vector.shape_cast %7 : vector<2x1x8xf32> to vector<2x8xf32>
    %c0_6 = arith.constant 0 : index
    %c0_7 = arith.constant 0 : index
    %9 = memref.load %arg2[%c0_6, %c0_7] : memref<4x2xf32, #tpu.memory_space<smem>>
    %10 = vector.broadcast %9 : f32 to vector<2x8xf32>
    %11 = arith.mulf %8, %10 : vector<2x8xf32>
    %12 = arith.addf %5, %11 : vector<2x8xf32>
    %13 = vector.extract_strided_slice %0 {offsets = [0, 0, 0], sizes = [2, 1, 8], strides = [1, 1, 1]} : vector<2x2x8xf32> to vector<2x1x8xf32>
    %14 = vector.shape_cast %13 : vector<2x1x8xf32> to vector<2x8xf32>
    %c2 = arith.constant 2 : index
    %c0_8 = arith.constant 0 : index
    %15 = memref.load %arg2[%c2, %c0_8] : memref<4x2xf32, #tpu.memory_space<smem>>
    %16 = vector.broadcast %15 : f32 to vector<2x8xf32>
    %17 = arith.mulf %14, %16 : vector<2x8xf32>
    %18 = arith.addf %6, %17 : vector<2x8xf32>
    %19 = vector.extract_strided_slice %0 {offsets = [0, 1, 0], sizes = [2, 1, 8], strides = [1, 1, 1]} : vector<2x2x8xf32> to vector<2x1x8xf32>
    %20 = vector.shape_cast %19 : vector<2x1x8xf32> to vector<2x8xf32>
    %c1 = arith.constant 1 : index
    %c0_9 = arith.constant 0 : index
    %21 = memref.load %arg2[%c1, %c0_9] : memref<4x2xf32, #tpu.memory_space<smem>>
    %22 = vector.broadcast %21 : f32 to vector<2x8xf32>
    %23 = arith.mulf %20, %22 : vector<2x8xf32>
    %24 = arith.addf %12, %23 : vector<2x8xf32>
    %25 = vector.extract_strided_slice %0 {offsets = [0, 1, 0], sizes = [2, 1, 8], strides = [1, 1, 1]} : vector<2x2x8xf32> to vector<2x1x8xf32>
    %26 = vector.shape_cast %25 : vector<2x1x8xf32> to vector<2x8xf32>
    %c3 = arith.constant 3 : index
    %c0_10 = arith.constant 0 : index
    %27 = memref.load %arg2[%c3, %c0_10] : memref<4x2xf32, #tpu.memory_space<smem>>
    %28 = vector.broadcast %27 : f32 to vector<2x8xf32>
    %29 = arith.mulf %26, %28 : vector<2x8xf32>
    %30 = arith.addf %18, %29 : vector<2x8xf32>
    %c0_11 = arith.constant 0 : index
    %c0_12 = arith.constant 0 : index
    %31 = memref.load %arg3[%c0_11, %c0_12] : memref<1x2xf32, #tpu.memory_space<smem>>
    %32 = vector.shape_cast %24 : vector<2x8xf32> to vector<2x8x1xf32>
    %33 = vector.broadcast %31 : f32 to vector<2x8x1xf32>
    %34 = arith.addf %33, %32 : vector<2x8x1xf32>
    %35 = vector.shape_cast %30 : vector<2x8xf32> to vector<2x1x8xf32>
    %36 = vector.broadcast %34 : vector<2x8x1xf32> to vector<2x8x8xf32>
    %37 = vector.broadcast %35 : vector<2x1x8xf32> to vector<2x8x8xf32>
    %38 = arith.addf %36, %37 : vector<2x8x8xf32>
    %cst_13 = arith.constant 0.000000e+00 : f32
    %39 = vector.broadcast %cst_13 : f32 to vector<2x8x8xf32>
    %40 = arith.maximumf %38, %39 : vector<2x8x8xf32>
    %c0_14 = arith.constant 0 : index
    %c0_15 = arith.constant 0 : index
    %41 = memref.load %arg4[%c0_14, %c0_15] : memref<2x1xf32, #tpu.memory_space<smem>>
    %42 = vector.broadcast %41 : f32 to vector<2x8x8xf32>
    %43 = arith.mulf %40, %42 : vector<2x8x8xf32>
    %44 = arith.addf %4, %43 : vector<2x8x8xf32>
    %cst_16 = arith.constant 0.000000e+00 : f32
    %45 = vector.broadcast %cst_16 : f32 to vector<2x8xf32>
    %cst_17 = arith.constant 0.000000e+00 : f32
    %46 = vector.broadcast %cst_17 : f32 to vector<2x8xf32>
    %47 = vector.extract_strided_slice %0 {offsets = [0, 0, 0], sizes = [2, 1, 8], strides = [1, 1, 1]} : vector<2x2x8xf32> to vector<2x1x8xf32>
    %48 = vector.shape_cast %47 : vector<2x1x8xf32> to vector<2x8xf32>
    %c0_18 = arith.constant 0 : index
    %c1_19 = arith.constant 1 : index
    %49 = memref.load %arg2[%c0_18, %c1_19] : memref<4x2xf32, #tpu.memory_space<smem>>
    %50 = vector.broadcast %49 : f32 to vector<2x8xf32>
    %51 = arith.mulf %48, %50 : vector<2x8xf32>
    %52 = arith.addf %45, %51 : vector<2x8xf32>
    %53 = vector.extract_strided_slice %0 {offsets = [0, 0, 0], sizes = [2, 1, 8], strides = [1, 1, 1]} : vector<2x2x8xf32> to vector<2x1x8xf32>
    %54 = vector.shape_cast %53 : vector<2x1x8xf32> to vector<2x8xf32>
    %c2_20 = arith.constant 2 : index
    %c1_21 = arith.constant 1 : index
    %55 = memref.load %arg2[%c2_20, %c1_21] : memref<4x2xf32, #tpu.memory_space<smem>>
    %56 = vector.broadcast %55 : f32 to vector<2x8xf32>
    %57 = arith.mulf %54, %56 : vector<2x8xf32>
    %58 = arith.addf %46, %57 : vector<2x8xf32>
    %59 = vector.extract_strided_slice %0 {offsets = [0, 1, 0], sizes = [2, 1, 8], strides = [1, 1, 1]} : vector<2x2x8xf32> to vector<2x1x8xf32>
    %60 = vector.shape_cast %59 : vector<2x1x8xf32> to vector<2x8xf32>
    %c1_22 = arith.constant 1 : index
    %c1_23 = arith.constant 1 : index
    %61 = memref.load %arg2[%c1_22, %c1_23] : memref<4x2xf32, #tpu.memory_space<smem>>
    %62 = vector.broadcast %61 : f32 to vector<2x8xf32>
    %63 = arith.mulf %60, %62 : vector<2x8xf32>
    %64 = arith.addf %52, %63 : vector<2x8xf32>
    %65 = vector.extract_strided_slice %0 {offsets = [0, 1, 0], sizes = [2, 1, 8], strides = [1, 1, 1]} : vector<2x2x8xf32> to vector<2x1x8xf32>
    %66 = vector.shape_cast %65 : vector<2x1x8xf32> to vector<2x8xf32>
    %c3_24 = arith.constant 3 : index
    %c1_25 = arith.constant 1 : index
    %67 = memref.load %arg2[%c3_24, %c1_25] : memref<4x2xf32, #tpu.memory_space<smem>>
    %68 = vector.broadcast %67 : f32 to vector<2x8xf32>
    %69 = arith.mulf %66, %68 : vector<2x8xf32>
    %70 = arith.addf %58, %69 : vector<2x8xf32>
    %c0_26 = arith.constant 0 : index
    %c1_27 = arith.constant 1 : index
    %71 = memref.load %arg3[%c0_26, %c1_27] : memref<1x2xf32, #tpu.memory_space<smem>>
    %72 = vector.shape_cast %64 : vector<2x8xf32> to vector<2x8x1xf32>
    %73 = vector.broadcast %71 : f32 to vector<2x8x1xf32>
    %74 = arith.addf %73, %72 : vector<2x8x1xf32>
    %75 = vector.shape_cast %70 : vector<2x8xf32> to vector<2x1x8xf32>
    %76 = vector.broadcast %74 : vector<2x8x1xf32> to vector<2x8x8xf32>
    %77 = vector.broadcast %75 : vector<2x1x8xf32> to vector<2x8x8xf32>
    %78 = arith.addf %76, %77 : vector<2x8x8xf32>
    %cst_28 = arith.constant 0.000000e+00 : f32
    %79 = vector.broadcast %cst_28 : f32 to vector<2x8x8xf32>
    %80 = arith.maximumf %78, %79 : vector<2x8x8xf32>
    %c1_29 = arith.constant 1 : index
    %c0_30 = arith.constant 0 : index
    %81 = memref.load %arg4[%c1_29, %c0_30] : memref<2x1xf32, #tpu.memory_space<smem>>
    %82 = vector.broadcast %81 : f32 to vector<2x8x8xf32>
    %83 = arith.mulf %80, %82 : vector<2x8x8xf32>
    %84 = arith.addf %44, %83 : vector<2x8x8xf32>
    %cst_31 = arith.constant 0.000000e+00 : f32
    %85 = vector.broadcast %cst_31 : f32 to vector<2x8x8xf32>
    %86 = vector.extract_strided_slice %0 {offsets = [0, 0, 0], sizes = [2, 1, 8], strides = [1, 1, 1]} : vector<2x2x8xf32> to vector<2x1x8xf32>
    %87 = vector.shape_cast %86 : vector<2x1x8xf32> to vector<2x8xf32>
    %88 = vector.shape_cast %87 : vector<2x8xf32> to vector<2x8x1xf32>
    %89 = vector.extract_strided_slice %0 {offsets = [0, 0, 0], sizes = [2, 1, 8], strides = [1, 1, 1]} : vector<2x2x8xf32> to vector<2x1x8xf32>
    %90 = vector.shape_cast %89 : vector<2x1x8xf32> to vector<2x8xf32>
    %91 = vector.shape_cast %90 : vector<2x8xf32> to vector<2x1x8xf32>
    %92 = vector.broadcast %88 : vector<2x8x1xf32> to vector<2x8x8xf32>
    %93 = vector.broadcast %91 : vector<2x1x8xf32> to vector<2x8x8xf32>
    %94 = arith.subf %92, %93 : vector<2x8x8xf32>
    %95 = math.absf %94 : vector<2x8x8xf32>
    %96 = arith.addf %85, %95 : vector<2x8x8xf32>
    %97 = vector.extract_strided_slice %0 {offsets = [0, 1, 0], sizes = [2, 1, 8], strides = [1, 1, 1]} : vector<2x2x8xf32> to vector<2x1x8xf32>
    %98 = vector.shape_cast %97 : vector<2x1x8xf32> to vector<2x8xf32>
    %99 = vector.shape_cast %98 : vector<2x8xf32> to vector<2x8x1xf32>
    %100 = vector.extract_strided_slice %0 {offsets = [0, 1, 0], sizes = [2, 1, 8], strides = [1, 1, 1]} : vector<2x2x8xf32> to vector<2x1x8xf32>
    %101 = vector.shape_cast %100 : vector<2x1x8xf32> to vector<2x8xf32>
    %102 = vector.shape_cast %101 : vector<2x8xf32> to vector<2x1x8xf32>
    %103 = vector.broadcast %99 : vector<2x8x1xf32> to vector<2x8x8xf32>
    %104 = vector.broadcast %102 : vector<2x1x8xf32> to vector<2x8x8xf32>
    %105 = arith.subf %103, %104 : vector<2x8x8xf32>
    %106 = math.absf %105 : vector<2x8x8xf32>
    %107 = arith.addf %96, %106 : vector<2x8x8xf32>
    %cst_32 = arith.constant 0.000000e+00 : f32
    %108 = vector.broadcast %cst_32 : f32 to vector<2x8x8xf32>
    %109 = arith.cmpf one, %107, %108 : vector<2x8x8xf32>
    %cst_33 = arith.constant -1.000000e+01 : f32
    %110 = vector.broadcast %cst_33 : f32 to vector<2x8x8xf32>
    %111 = arith.select %109, %84, %110 : vector<2x8x8xi1>, vector<2x8x8xf32>
    %c0_34 = arith.constant 0 : index
    %c0_35 = arith.constant 0 : index
    %c0_36 = arith.constant 0 : index
    %112 = vector.load %arg6[%c0_34, %c0_35, %c0_36] : memref<2x8x8xf32, #tpu.memory_space<vmem>>, vector<2x8x8xf32>
    tpu.vector_store %arg6[%c0_34, %c0_35, %c0_36], %111 {strides = array<i32>} : memref<2x8x8xf32, #tpu.memory_space<vmem>>, vector<2x8x8xf32>,
    return
  }
  func.func @transform_0(%arg0: i32) -> (i32, i32, i32) {
    %c0_i32 = arith.constant 0 : i32
    %c0_i32_0 = arith.constant 0 : i32
    %c0_i32_1 = arith.constant 0 : i32
    return %arg0, %c0_i32, %c0_i32_0 : i32, i32, i32
  }
  func.func @transform_1(%arg0: i32) -> (i32, i32) {
    %c0_i32 = arith.constant 0 : i32
    %c0_i32_0 = arith.constant 0 : i32
    %c0_i32_1 = arith.constant 0 : i32
    return %c0_i32, %c0_i32_0 : i32, i32
  }
  func.func @transform_2(%arg0: i32) -> (i32, i32) {
    %c0_i32 = arith.constant 0 : i32
    %c0_i32_0 = arith.constant 0 : i32
    %c0_i32_1 = arith.constant 0 : i32
    return %c0_i32, %c0_i32_0 : i32, i32
  }
  func.func @transform_3(%arg0: i32) -> (i32, i32) {
    %c0_i32 = arith.constant 0 : i32
    %c0_i32_0 = arith.constant 0 : i32
    %c0_i32_1 = arith.constant 0 : i32
    return %c0_i32, %c0_i32_0 : i32, i32
  }
  func.func @transform_4(%arg0: i32) -> (i32, i32) {
    %c0_i32 = arith.constant 0 : i32
    %c0_i32_0 = arith.constant 0 : i32
    %c0_i32_1 = arith.constant 0 : i32
    return %c0_i32, %c0_i32_0 : i32, i32
  }
  func.func @transform_5(%arg0: i32) -> (i32, i32, i32) {
    %c0_i32 = arith.constant 0 : i32
    %c0_i32_0 = arith.constant 0 : i32
    %c0_i32_1 = arith.constant 0 : i32
    return %arg0, %c0_i32, %c0_i32_0 : i32, i32, i32
  }
}

</mosaic_0001>

<bundles_post_ra>
// kernel: tpu_custom_call.1
= control target key start
LH: loop header
LB: loop body
LE: loop exit
PB: predicated region body
PF: predicated region fallthrough
CT: control target
= control target key end

     0   :  { %11 = vsyncpa [#allocation5], 0  ;;  %s441_s0 = inlined_call_operand.vmem [shape: f32[2,2,8], index: 0, kind: input, shape index: {}]   ;;  %s442_s1 = inlined_call_operand.vmem [shape: f32[4,2], index: 1, kind: input, shape index: {}]   ;;  %s443_s2 = inlined_call_operand.vmem [shape: f32[1,2], index: 2, kind: input, shape index: {}]   ;;  %s444_s3 = inlined_call_operand.vmem [shape: f32[2,1], index: 3, kind: input, shape index: {}]   ;;  %s445_s4 = inlined_call_operand.<no memory space> [shape: f32[1,1], index: 4, kind: input, shape index: {}]   ;;  %s446_s5 = inlined_call_operand.hbm [shape: f32[2,8,8], index: 5, kind: output, shape index: {}]  }
   0x1   :  { %12 = vsyncpa [#allocation7], 0  ;;  %s30_s20 = sshll.u32 %s443_s2, 4  ;;  %s31_s20 = int_to_ptr.vmem [resolvable:$true] %s30_s20 }
   0x2   :  { %13 = vsyncpa [#allocation4], 0  ;;  %s21_s23 = sshll.u32 %s442_s1, 4  ;;  %s346_s24 = smov [#allocation6]   ;;  %s22_s23 = int_to_ptr.vmem [resolvable:$true] %s21_s23 }
   0x3   :  { %33 = dma.vmem_to_smem %s31_s20, 16, %s346_s24, [#allocation7]  }
   0x4   :  { %s347_s25 = smov [#allocation3]   ;;  %s39_s28 = sshll.u32 %s444_s3, 4  ;;  %s40_s28 = int_to_ptr.vmem [resolvable:$true] %s39_s28 }
   0x5   :  { %24 = dma.vmem_to_smem %s22_s23, 64, %s347_s25, [#allocation5]  }
   0x6   :  { %s348_s29 = smov [#allocation8]  }
   0x7   :  { %42 = dma.vmem_to_smem %s40_s28, 32, %s348_s29, [#allocation7]  }
   0x8   :  { %340 = dma.done.wait [#allocation5], 64  }
   0x9   :  { %341 = vsyncadd [#allocation5], 4294967232 }
   0xa   :  { %342 = dma.done.wait [#allocation7], 48  }
   0xb   :  { %343 = vsyncadd [#allocation7], 4294967248 }
   0xc   :  { %57 = sfence }
   0xd   :  { %v101_v0 = vlaneseq  ;;  %s265_s2 = sld [smem:[#allocation3 + $0x1]]  ;;  %v394_v2 = vld [vmem:[%s441_s0] sm:$0x3]  ;;  %v399_v3 = vld [vmem:[%s441_s0 + $0x2] sm:$0x3]  ;;  %s349_s19 = smov [#allocation9]  }
   0xe   :  { %s267_s1 = sld [smem:[#allocation3 + $0x81]]  ;;  %v195_v11 = vperm.slane %v394_v2, 0  ;;  %v202_v26 = vperm.slane %v399_v3, 0  ;;  %v222_v30 = vperm.slane %v399_v3, 1  ;;  %v215_v31 = vperm.slane %v394_v2, 1  ;;  %s246_s20 = sshll.u32 %s349_s19, 4  ;;  %s247_s20 = int_to_ptr.vmem [resolvable:$true] %s246_s20 }
   0xf   :  { %v102_v1 = vshrl.u32 %v101_v0, 7  ;;  %s63_s30 = sld [smem:[#allocation3]]  ;;  %s248_s22 = sshll.u32 %s446_s5, 4  ;;  %vm239_vm0 = vcmask 64512   ;;  %s249_s22 = int_to_ptr.hbm [resolvable:$true] %s248_s22 }
  0x10   :  { %s263_s6 = sld [smem:[#allocation3 + $0x80]]  ;;  %s350_s23 = smov 128  }
  0x11   :  { %279 = vset.pattern.permute.xlu1 %v102_v1  ;;  %278 = vset.pattern.permute.xlu0 %v102_v1  ;;  %s264_s0 = sld [smem:[#allocation3 + $0x180]]  ;;  %s351_s24 = smov 8  }
  0x12   :  { %277 = vset.pattern.permute.xlu2 %v102_v1  ;;  %s262_s10 = sld [smem:[#allocation3 + $0x100]] }
  0x13   :  { %v130_v4 = vstv %s265_s2  ;;  %s268_s11 = sld [smem:[#allocation3 + $0x181]] }
  0x14   :  { %v142_v5 = vstv %s267_s1  ;;  %v131_v6 = vmul.f32 %v130_v4, %v394_v2  ;;  %v132_v16 = vmul.f32 %v130_v4, %v399_v3  ;;  %s266_s12 = sld [smem:[#allocation3 + $0x101]] }
  0x15   :  { %v143_v7 = vmul.f32 %v142_v5, %v394_v2  ;;  %v144_v8 = vmul.f32 %v142_v5, %v399_v3  ;;  %v64_v9 = vstv %s63_s30  ;;  %s418_s13 = sld [smem:[#allocation6]] }
  0x16   :  { %v76_v10 = vstv %s263_s6  ;;  %v65_v13 = vmul.f32 %v64_v9, %v394_v2  ;;  %v66_v21 = vmul.f32 %v64_v9, %v399_v3  ;;  %s269_s14 = sld [smem:[#allocation6 + $0x1]] }
  0x17   :  { %v147_v12 = vrot.slane %v143_v7, 1  ;;  %v77_v14 = vmul.f32 %v76_v10, %v394_v2  ;;  %v78_v15 = vmul.f32 %v76_v10, %v399_v3  ;;  %v148_v19 = vrot.slane %v144_v8, 1  ;;  %s123_s15 = sld [smem:[#allocation8]] }
  0x18   :  { %v88_v32 = vstv %s264_s0  ;;  %v70_v34 = vstv %s262_s10  ;;  %s428_s16 = sld [smem:[#allocation8 + $0x80]] }
  0x19   :  { %v151_v17 = vadd.f32 %v147_v12, %v131_v6  ;;  %v81_v18 = vrot.slane %v77_v14, 1  ;;  %v82_v23 = vrot.slane %v78_v15, 1  ;;  %v152_v25 = vadd.f32 %v148_v19, %v132_v16 }
  0x1a   :  { %200 = vperm.xlu2 %277, %v195_v11   ;;  %v89_v33 = vmul.f32 %v88_v32, %v394_v2  ;;  %v154_v35 = vstv %s268_s11  ;;  %v71_v36 = vmul.f32 %v70_v34, %v394_v2  ;;  %v90_v39 = vmul.f32 %v88_v32, %v399_v3 }
  0x1b   :  { %v166_v20 = vperm.slane %v151_v17, 0  ;;  %v85_v22 = vadd.f32 %v81_v18, %v65_v13  ;;  %v86_v27 = vadd.f32 %v82_v23, %v66_v21  ;;  %v173_v28 = vperm.slane %v152_v25, 0 }
  0x1c   :  { %v93_v37 = vrot.slane %v89_v33, 1  ;;  %v156_v38 = vmul.f32 %v154_v35, %v399_v3  ;;  %v155_v40 = vmul.f32 %v154_v35, %v394_v2  ;;  %v136_v41 = vstv %s266_s12 }
  0x1d   :  { %171 = vperm.xlu1 %279, %v166_v20   ;;  %v100_v24 = vperm.slane %v85_v22, 0  ;;  %v107_v29 = vperm.slane %v86_v27, 0  ;;  %v138_v44 = vmul.f32 %v136_v41, %v399_v3  ;;  %v114_v46 = vstv %s418_s13 }
  0x1e   :  { %v97_v43 = vadd.f32 %v93_v37, %v71_v36  ;;  %v160_v45 = vrot.slane %v156_v38, 1  ;;  %v72_v47 = vmul.f32 %v70_v34, %v399_v3  ;;  %v94_v48 = vrot.slane %v90_v39, 1 }
  0x1f   :  { %105 = vperm.xlu0 %278, %v100_v24   ;;  %v137_v50 = vmul.f32 %v136_v41, %v394_v2  ;;  %v159_v51 = vrot.slane %v155_v40, 1  ;;  %v180_v58 = vstv %s269_s14  ;;  %v124_v8 = vstv %s123_s15 }
  0x20   :  { %v117_v53 = vperm.slane %v97_v43, 0  ;;  %v164_v55 = vadd.f32 %v160_v45, %v138_v44  ;;  %v98_v56 = vadd.f32 %v94_v48, %v72_v47  ;;  %v61_v18 = vstv %s445_s4 }
  0x21   :  { %v163_v57 = vadd.f32 %v159_v51, %v137_v50  ;;  %v190_v21 = vstv %s428_s16 }
  0x22   :  { %207 = vperm.xlu2 %277, %v202_v26   ;;  %v184_v60 = vperm.slane %v164_v55, 0  ;;  %v118_v63 = vperm.slane %v98_v56, 0 }
  0x23   :  { %v183_v0 = vperm.slane %v163_v57, 0 }
  0x25   :  { %178 = vperm.xlu1 %279, %v173_v28  }
  0x27   :  { %112 = vperm.xlu0 %278, %v107_v29  }
  0x2d   :  { %227 = vperm.xlu1 %279, %v222_v30  }
  0x2f   :  { %220 = vperm.xlu0 %278, %v215_v31  }
  0x74   :  { %v201_v49 = vpop.permute.xlu2 %200 }
  0x75   :  { %v209_v17 = vsub.f32 %v201_v49, %v195_v11 }
  0x77   :  { %v211_v32 = vand.u32 2147483647, %v209_v17 }
  0x7c   :  { %v208_v6 = vpop.permute.xlu2 %207 }
  0x7d   :  { %v210_v12 = vsub.f32 %v208_v6, %v202_v26 }
  0x7f   :  { %v212_v24 = vand.u32 2147483647, %v210_v12 }
  0x8f   :  { %v172_v42 = vpop.permute.xlu1 %171 }
  0x90   :  { %v181_v1 = vadd.f32 %v180_v58, %v172_v42 }
  0x91   :  { %v106_v52 = vpop.permute.xlu0 %105 }
  0x92   :  { %v115_v54 = vadd.f32 %v114_v46, %v106_v52  ;;  %v185_v10 = vadd.f32 %v183_v0, %v181_v1 }
  0x94   :  { %v119_v59 = vadd.f32 %v117_v53, %v115_v54  ;;  %v187_v22 = vmax.f32 %v185_v10, 0.0 }
  0x96   :  { %v121_v5 = vmax.f32 %v119_v59, 0.0 }
  0x97   :  { %v179_v61 = vpop.permute.xlu1 %178 }
  0x98   :  { %v182_v62 = vadd.f32 %v180_v58, %v179_v61  ;;  %v125_v14 = vmul.f32 %v124_v8, %v121_v5 }
  0x99   :  { %v113_v3 = vpop.permute.xlu0 %112 }
  0x9a   :  { %v116_v4 = vadd.f32 %v114_v46, %v113_v3  ;;  %v186_v7 = vadd.f32 %v184_v60, %v182_v62  ;;  %v127_v28 = vadd.f32 %v125_v14, %v61_v18 }
  0x9c   :  { %v120_v9 = vadd.f32 %v118_v63, %v116_v4  ;;  %v188_v15 = vmax.f32 %v186_v7, 0.0 }
  0x9e   :  { %v122_v13 = vmax.f32 %v120_v9, 0.0  ;;  %v192_v29 = vmul.f32 %v190_v21, %v188_v15 }
  0x9f   :  { %v228_v16 = vpop.permute.xlu1 %227 }
  0xa0   :  { %v126_v19 = vmul.f32 %v124_v8, %v122_v13  ;;  %v230_v20 = vsub.f32 %v228_v16, %v222_v30  ;;  %v191_v30 = vmul.f32 %v190_v21, %v187_v22 }
  0xa1   :  { %v221_v23 = vpop.permute.xlu0 %220 }
  0xa2   :  { %v128_v25 = vadd.f32 %v126_v19, %v61_v18  ;;  %v232_v27 = vand.u32 2147483647, %v230_v20  ;;  %v229_v26 = vsub.f32 %v221_v23, %v215_v31  ;;  %v193_v37 = vadd.f32 %v191_v30, %v127_v28 }
  0xa4   :  { %v234_v33 = vadd.f32 %v232_v27, %v212_v24  ;;  %v231_v11 = vand.u32 2147483647, %v229_v26  ;;  %v194_v34 = vadd.f32 %v192_v29, %v128_v25 }
  0xa6   :  { %vm236_vm1 = vcmp.ne.f32.partialorder %v234_v33, 0.0  ;;  %v233_v35 = vadd.f32 %v231_v11, %v211_v32 }
  0xa7   :  { %v238_v36 = vsel %vm236_vm1, %v194_v34, -10.0 }
  0xa8   :  { %241 = vst.msk [vmem:[#allocation9 + $0x8] sm:$0xff] %vm239_vm0, %v238_v36  ;;  %vm235_vm2 = vcmp.ne.f32.partialorder %v233_v35, 0.0 }
  0xa9   :  { %v237_v2 = vsel %vm235_vm2, %v193_v37, -10.0 }
  0xaa   :  { %240 = vst.msk [vmem:[#allocation9] sm:$0xff] %vm239_vm0, %v237_v2 }
  0xab   :  { %254 = dma.vmem_to_hbm [thread:$0]  %s247_s20, 256, %s249_s22, [#allocation4], %s350_s23, %s350_s23, %s351_s24  }
  0xac   :  { %344 = dma.done.wait [#allocation4], 256  }
  0xad   :  { %345 = vsyncadd [#allocation4], 4294967040 }
  0xae   :  { %259 = vsyncpa [#allocation4], 1 }
  0xaf   :  { %260 = vsyncpa [#allocation5], 1 }
  0xb0   :  { %261 = vsyncpa [#allocation7], 1 }

</bundles_post_ra>
